<compile_context>
chip_gen: v7x
topology: tpu7x:2x2x1
jax: 0.10.0
libtpu: 0.0.40
codegen_flags: <defaults>
</compile_context>

<pallas_src>
import functools

import jax
import jax.numpy as jnp
from jax import lax
from jax.experimental import pallas as pl
from jax.experimental.pallas import tpu as pltpu


def _round_up(x, m):
    return ((x + m - 1) // m) * m


# ---------------------------------------------------------------------------
# Box coordinate helpers (plain JAX glue)
# ---------------------------------------------------------------------------
def cxcy_to_xy(cxcy):
    """(..., 4) center-size -> boundary coordinates."""
    return jnp.concatenate(
        [cxcy[..., :2] - cxcy[..., 2:] / 2.0, cxcy[..., :2] + cxcy[..., 2:] / 2.0],
        axis=-1,
    )


def xy_to_cxcy_t(xy_t):
    """Transposed variant: coords on axis -2, shape (..., 4, P)."""
    return jnp.concatenate(
        [(xy_t[..., :2, :] + xy_t[..., 2:, :]) / 2.0,
         xy_t[..., 2:, :] - xy_t[..., :2, :]],
        axis=-2,
    )


def cxcy_to_gcxgcy_t(cxcy_t, priors_cxcy_t):
    """Transposed variant: cxcy_t (..., 4, P), priors_cxcy_t (4, P)."""
    return jnp.concatenate(
        [(cxcy_t[..., :2, :] - priors_cxcy_t[:2, :]) / (priors_cxcy_t[2:, :] / 10.0),
         jnp.log(cxcy_t[..., 2:, :] / priors_cxcy_t[2:, :]) * 5.0],
        axis=-2,
    )


# ---------------------------------------------------------------------------
# Pallas kernel 1: batched IoU + fused max/argmax reductions (single prior tile)
#   grid = (N,)  semantics = ("parallel",)
# ---------------------------------------------------------------------------
def _match_kernel(boxes_ref, priors_ref, bo_ref, bobj_ref, obp_ref):
    # NOTE: boxes stay (M_pad, 4); the 1-lane column slices are tiny
    # (M_pad <= ~16) and kept for lowering simplicity.
    b = boxes_ref[0].astype(jnp.float32)        # (M_pad, 4)
    p = priors_ref[...].astype(jnp.float32)     # (4, P_pad)
    m_pad = b.shape[0]
    p_pad = p.shape[1]

    bx1, by1, bx2, by2 = b[:, 0:1], b[:, 1:2], b[:, 2:3], b[:, 3:4]   # (M_pad, 1)
    px1, py1, px2, py2 = p[0:1, :], p[1:2, :], p[2:3, :], p[3:4, :]   # (1, P_pad)

    iw = jnp.maximum(jnp.minimum(bx2, px2) - jnp.maximum(bx1, px1), 0.0)
    ih = jnp.maximum(jnp.minimum(by2, py2) - jnp.maximum(by1, py1), 0.0)
    inter = iw * ih                                                    # (M_pad, P_pad)
    area_b = (bx2 - bx1) * (by2 - by1)
    area_p = (px2 - px1) * (py2 - py1)
    union = jnp.maximum(area_b + area_p - inter, 1e-10)   # eps guards 0-area pads
    ov = inter / union                                                 # (M_pad, P_pad)

    # best object per prior (sublane reduction over objects) -> lane-dense out
    best = jnp.max(ov, axis=0, keepdims=True)                          # (1, P_pad)
    obj_col = lax.broadcasted_iota(jnp.int32, (m_pad, 1), 0)           # small iota
    first_obj = jnp.min(
        jnp.where(ov == best, obj_col, m_pad), axis=0, keepdims=True
    )                                                                  # (1, P_pad)
    bo_ref[0] = best
    bobj_ref[0] = first_obj

    # best prior per object (lane reduction), whole prior range in one tile
    row_best = jnp.max(ov, axis=1, keepdims=True)                      # (M_pad, 1)
    prior_row = lax.broadcasted_iota(jnp.int32, (1, p_pad), 1)         # small iota
    row_arg = jnp.min(
        jnp.where(ov == row_best, prior_row, p_pad), axis=1, keepdims=True
    )                                                                  # (M_pad, 1)
    obp_ref[0] = row_arg


def match_pallas(boxes_pad, priors_t_pad):
    """boxes_pad: (N, M_pad, 4) xy GT boxes; priors_t_pad: (4, P_pad) xy priors.
    Returns best_overlap (N, P_pad) f32, best_object (N, P_pad) i32,
    best_prior_per_object (N, M_pad) i32."""
    n, m_pad, _ = boxes_pad.shape
    p_pad = priors_t_pad.shape[1]
    best_ov, best_obj, obj_prior = pl.pallas_call(
        _match_kernel,
        out_shape=(
            jax.ShapeDtypeStruct((n, 1, p_pad), jnp.float32),
            jax.ShapeDtypeStruct((n, 1, p_pad), jnp.int32),
            jax.ShapeDtypeStruct((n, m_pad, 1), jnp.int32),
        ),
        grid=(n,),
        in_specs=[
            pl.BlockSpec((1, m_pad, 4), lambda i: (i, 0, 0)),
            pl.BlockSpec((4, p_pad), lambda i: (0, 0)),
        ],
        out_specs=(
            pl.BlockSpec((1, 1, p_pad), lambda i: (i, 0, 0)),
            pl.BlockSpec((1, 1, p_pad), lambda i: (i, 0, 0)),
            pl.BlockSpec((1, m_pad, 1), lambda i: (i, 0, 0)),
        ),
        compiler_params=pltpu.CompilerParams(
            dimension_semantics=("parallel",)),
    )(boxes_pad.astype(jnp.float32), priors_t_pad)
    return best_ov[:, 0, :], best_obj[:, 0, :], obj_prior[..., 0]


# ---------------------------------------------------------------------------
# Pallas kernel 2: per-prior cross-entropy + positive-masked L1 loc loss
#   grid = (N,) — one whole image per step, natural input layouts,
#   one in-kernel transpose makes priors the lane axis for all heavy math.
# ---------------------------------------------------------------------------
def _loss_kernel(locs_ref, tlocs_ref, scores_ref, tcls_ref, ce_ref, loc_ref,
                 *, bf16_exp):
    tc = tcls_ref[0]                                            # (1, P) int32

    # cross-entropy (reduction='none'): logsumexp(scores) - scores[true_class]
    st = jnp.transpose(scores_ref[0].astype(jnp.float32))       # (C, P), lanes dense
    m = jnp.max(st, axis=0, keepdims=True)                      # (1, P)
    z = st - m
    if bf16_exp:   # v6e/v7x: EUP bf16 exp ~2x throughput; off by default
        e = jnp.exp(z.astype(jnp.bfloat16)).astype(jnp.float32)
    else:
        e = jnp.exp(z)
    lse = jnp.log(jnp.sum(e, axis=0, keepdims=True)) + m        # (1, P)
    cls_ids = lax.broadcasted_iota(jnp.int32, (st.shape[0], 1), 0)   # (C, 1) iota
    true_logit = jnp.sum(jnp.where(cls_ids == tc, st, 0.0), axis=0, keepdims=True)
    ce_ref[0] = lse - true_logit                                 # lane-dense store

    # L1 localization loss summed over coords, pre-masked by positive priors
    pos = (tc != 0).astype(jnp.float32)
    d = jnp.abs(locs_ref[0].astype(jnp.float32)
                - tlocs_ref[0].astype(jnp.float32))              # (4, P)
    loc_ref[0] = jnp.sum(d, axis=0, keepdims=True) * pos


def per_prior_losses_pallas(pred_locs_t, true_locs_t, pred_scores, true_classes,
                            *, bf16_exp=False):
    """pred_locs_t / true_locs_t: (N, 4, P); pred_scores: (N, P, C) natural
    layout; true_classes: (N, 1, P) int32.  Returns (CE, masked-L1), each
    (N, 1, P) float32."""
    n, p, c = pred_scores.shape
    kernel = functools.partial(_loss_kernel, bf16_exp=bf16_exp)
    ce, loc = pl.pallas_call(
        kernel,
        out_shape=(
            jax.ShapeDtypeStruct((n, 1, p), jnp.float32),
            jax.ShapeDtypeStruct((n, 1, p), jnp.float32),
        ),
        grid=(n,),
        in_specs=[
            pl.BlockSpec((1, 4, p), lambda i: (i, 0, 0)),
            pl.BlockSpec((1, 4, p), lambda i: (i, 0, 0)),
            pl.BlockSpec((1, p, c), lambda i: (i, 0, 0)),
            pl.BlockSpec((1, 1, p), lambda i: (i, 0, 0)),
        ],
        out_specs=(
            pl.BlockSpec((1, 1, p), lambda i: (i, 0, 0)),
            pl.BlockSpec((1, 1, p), lambda i: (i, 0, 0)),
        ),
        compiler_params=pltpu.CompilerParams(
            dimension_semantics=("parallel",),
            # explicit cap; keeps headroom on v7x's 64 MiB VMEM, raises the
            # v5e 16 MiB scoped default.
            vmem_limit_bytes=48 * 1024 * 1024,
        ),
        cost_estimate=pl.CostEstimate(
            flops=10 * n * p * c,
            transcendentals=n * p * (c + 1),
            bytes_accessed=4 * n * p * (c + 11),
        ),
    )(pred_locs_t, true_locs_t, pred_scores, true_classes)
    return ce, loc


# ---------------------------------------------------------------------------
# Pallas kernel 3: hard-negative mining (exact top-k sum, no full sort)
#   grid = (N,) — per image: n_pos, sum of positive CE, and the sum of the
#   (neg_pos_ratio * n_pos) largest negative CEs via a bit-level binary
#   search for the k-th largest value (exact; CE >= 0 so IEEE bits are
#   order-preserving).
# ---------------------------------------------------------------------------
def _mine_kernel(ce_ref, tcls_ref, pos_ref, neg_ref, npos_ref, *, neg_pos_ratio):
    ce = ce_ref[0]                                   # (1, P) f32
    tc = tcls_ref[0]                                 # (1, P) int32
    pos = tc != 0
    posf = pos.astype(jnp.float32)
    n_pos = jnp.sum(pos.astype(jnp.int32))           # scalar int32

    pos_ref[...] = jnp.full((1, 1, 1), jnp.sum(ce * posf), jnp.float32)
    npos_ref[...] = jnp.full((1, 1, 1), n_pos.astype(jnp.float32), jnp.float32)

    # negatives' CE (positives zeroed); clamp guards any -0.0 for the bit trick
    x = jnp.where(pos, 0.0, jnp.maximum(ce, 0.0))    # (1, P), all >= 0
    xbits = pltpu.bitcast(x, jnp.int32)              # monotone in value
    k = n_pos * jnp.int32(neg_pos_ratio)

    def body(_, carry):
        lo, hi = carry
        mid = lo + (hi - lo + jnp.int32(1)) // jnp.int32(2)
        ok = jnp.sum((xbits >= mid).astype(jnp.int32)) >= k
        return (jnp.where(ok, mid, lo), jnp.where(ok, hi, mid - jnp.int32(1)))

    # lo converges to the bit pattern of the k-th largest value (or 0).
    lo, _ = lax.fori_loop(0, 32, body, (jnp.int32(0), jnp.int32(0x7F800000)))

    gt = xbits > lo
    cnt_gt = jnp.sum(gt.astype(jnp.int32))
    sum_gt = jnp.sum(jnp.where(gt, x, 0.0))
    kth = jnp.max(jnp.where(gt, 0.0, x))             # value of the k-th largest
    res = sum_gt + (k - cnt_gt).astype(jnp.float32) * kth
    neg_ref[...] = jnp.full((1, 1, 1), jnp.where(k > 0, res, 0.0), jnp.float32)


def hard_negative_stats_pallas(conf_loss_all, true_classes, *, neg_pos_ratio):
    """conf_loss_all / true_classes: (N, 1, P).  Per image returns
    (sum positive CE, sum of hard-negative CE, n_pos) as (N,) float32 each."""
    n, _, p = conf_loss_all.shape
    kernel = functools.partial(_mine_kernel, neg_pos_ratio=int(neg_pos_ratio))
    pos_sum, hneg_sum, n_pos = pl.pallas_call(
        kernel,
        out_shape=(
            jax.ShapeDtypeStruct((n, 1, 1), jnp.float32),
            jax.ShapeDtypeStruct((n, 1, 1), jnp.float32),
            jax.ShapeDtypeStruct((n, 1, 1), jnp.float32),
        ),
        grid=(n,),
        in_specs=[
            pl.BlockSpec((1, 1, p), lambda i: (i, 0, 0)),
            pl.BlockSpec((1, 1, p), lambda i: (i, 0, 0)),
        ],
        out_specs=(
            pl.BlockSpec((1, 1, 1), lambda i: (i, 0, 0)),
            pl.BlockSpec((1, 1, 1), lambda i: (i, 0, 0)),
            pl.BlockSpec((1, 1, 1), lambda i: (i, 0, 0)),
        ),
        compiler_params=pltpu.CompilerParams(
            dimension_semantics=("parallel",)),
    )(conf_loss_all, true_classes)
    return pos_sum[:, 0, 0], hneg_sum[:, 0, 0], n_pos[:, 0, 0]


# ---------------------------------------------------------------------------
# MultiBoxLoss forward
# ---------------------------------------------------------------------------
class MultiBoxLoss:
    def __init__(self, priors_cxcy, threshold=0.5, neg_pos_ratio=3, alpha=1.0,
                 bf16_exp=False):
        self.priors_cxcy = jnp.asarray(priors_cxcy, jnp.float32)      # (P, 4)
        self.priors_xy = cxcy_to_xy(self.priors_cxcy)                 # (P, 4)
        self.threshold = threshold
        self.neg_pos_ratio = neg_pos_ratio
        self.alpha = alpha
        self.bf16_exp = bf16_exp   # enable on v6e/v7x for ~2x EUP exp throughput

        p = self.priors_cxcy.shape[0]
        self.n_priors = p
        self.p_pad = _round_up(p, 128)
        # constants hoisted out of __call__: coords on sublanes, priors on lanes
        self.priors_xy_t_pad = jnp.pad(
            self.priors_xy.T.astype(jnp.float32), ((0, 0), (0, self.p_pad - p)))
        self.priors_cxcy_t = self.priors_cxcy.T                        # (4, P)

    def __call__(self, predicted_locs, predicted_scores, boxes, labels):
        batch_size, n_priors, _ = predicted_locs.shape
        n_classes = predicted_scores.shape[2]
        assert n_priors == self.n_priors == predicted_scores.shape[1]

        # pad the per-image GT lists to a common (small) object count
        n_objects = jnp.asarray([b.shape[0] for b in boxes], jnp.int32)      # (N,)
        m_max = max(int(b.shape[0]) for b in boxes)
        m_pad = max(8, _round_up(m_max, 8))
        boxes_pad = jnp.stack([
            jnp.pad(jnp.asarray(b, jnp.float32), ((0, m_pad - b.shape[0]), (0, 0)))
            for b in boxes])                                                 # (N, M_pad, 4)
        labels_pad = jnp.stack([
            jnp.pad(jnp.asarray(l, jnp.int32), (0, m_pad - l.shape[0]))
            for l in labels])                                                # (N, M_pad)

        # --- Pallas kernel 1: batched IoU + fused argmax reductions ---
        best_ov, best_obj, prior_for_obj = match_pallas(
            boxes_pad, self.priors_xy_t_pad)
        best_ov = best_ov[:, :n_priors]                                      # (N, P)
        best_obj = best_obj[:, :n_priors]                                    # (N, P)

        # TODO(synk): data-dependent forced-match scatter + matched-box gather
        # kept in plain JAX (no clean BlockSpec expression for these).
        # NOTE: winner on prior collisions is unspecified here vs. last-write-
        # wins object order in the PyTorch reference (rare edge case).
        b_idx = jnp.arange(batch_size, dtype=jnp.int32)[:, None]             # (N, 1)
        m_idx = jnp.arange(m_pad, dtype=jnp.int32)[None, :]                  # (1, M_pad)
        valid = m_idx < n_objects[:, None]
        safe_prior = jnp.where(valid, prior_for_obj, n_priors)               # OOB -> drop
        b_full = jnp.broadcast_to(b_idx, (batch_size, m_pad))
        m_full = jnp.broadcast_to(m_idx, (batch_size, m_pad))
        object_for_each_prior = best_obj.at[b_full, safe_prior].set(m_full, mode="drop")
        overlap_for_each_prior = best_ov.at[b_full, safe_prior].set(1.0, mode="drop")

        label_for_each_prior = labels_pad[b_idx, object_for_each_prior]      # (N, P)
        true_classes = jnp.where(
            overlap_for_each_prior < self.threshold, 0, label_for_each_prior)

        # matched GT boxes gathered directly in (N, 4, P) layout so the loss
        # kernel sees lane-dense coordinate rows without transposing a
        # prior-sized tensor in XLA.
        boxes_pad_t = jnp.swapaxes(boxes_pad, 1, 2)                          # (N, 4, M_pad)
        gather_idx = jnp.broadcast_to(
            object_for_each_prior[:, None, :], (batch_size, 4, n_priors))
        matched_t = jnp.take_along_axis(boxes_pad_t, gather_idx, axis=2)     # (N, 4, P)
        true_locs_t = cxcy_to_gcxgcy_t(xy_to_cxcy_t(matched_t), self.priors_cxcy_t)
        pred_locs_t = jnp.swapaxes(predicted_locs, 1, 2)    # (N, 4, P); 4-wide, cheap

        tcls = true_classes.reshape(batch_size, 1, n_priors).astype(jnp.int32)

        # --- Pallas kernel 2: per-prior CE + positive-masked L1 ---
        conf_loss_all, loc_l1_pos = per_prior_losses_pallas(
            pred_locs_t, true_locs_t, predicted_scores, tcls,
            bf16_exp=self.bf16_exp)                                          # (N, 1, P)

        # --- Pallas kernel 3: exact hard-negative mining (replaces top_k) ---
        pos_ce, hard_neg_ce, n_pos = hard_negative_stats_pallas(
            conf_loss_all, tcls, neg_pos_ratio=self.neg_pos_ratio)           # (N,)

        total_pos = jnp.sum(n_pos)
        # NaN when there are zero positives, same as the PyTorch reference.
        loc_loss = jnp.sum(loc_l1_pos) / (4.0 * total_pos)
        conf_loss = (jnp.sum(hard_neg_ce) + jnp.sum(pos_ce)) / total_pos
        return conf_loss + self.alpha * loc_loss


# ---------------------------------------------------------------------------
# Demo
# ---------------------------------------------------------------------------
if __name__ == "__main__":
    key = jax.random.PRNGKey(0)

    N = 2            # batch
    P = 256          # number of priors
    C = 8            # number of classes (0 = background)
    M = 3            # objects per image (fixed in this synthetic demo)

    # deterministic prior grid: 16x16 centers, fixed size, in cxcy form
    g = 16
    cx = (jnp.arange(g, dtype=jnp.float32) + 0.5) / g
    cy = (jnp.arange(g, dtype=jnp.float32) + 0.5) / g
    cxg, cyg = jnp.meshgrid(cx, cy, indexing="ij")
    priors_cxcy = jnp.stack(
        [cxg.reshape(-1), cyg.reshape(-1),
         jnp.full((P,), 0.15, jnp.float32), jnp.full((P,), 0.15, jnp.float32)],
        axis=1,
    )

    k1, k2, k3, k4, k5 = jax.random.split(key, 5)
    predicted_locs = jax.random.normal(k1, (N, P, 4), jnp.float32)
    predicted_scores = jax.random.normal(k2, (N, P, C), jnp.float32)

    # ground-truth boxes (valid xmin<xmax, ymin<ymax, inside [0,1]) and labels
    centers = 0.2 + 0.6 * jax.random.uniform(k3, (N, M, 2))
    sizes = 0.10 + 0.20 * jax.random.uniform(k4, (N, M, 2))
    boxes_all = jnp.concatenate([centers - sizes / 2.0, centers + sizes / 2.0], axis=-1)
    labels_all = jax.random.randint(k5, (N, M), 1, C)

    boxes = [boxes_all[i] for i in range(N)]
    labels = [labels_all[i] for i in range(N)]

    criterion = MultiBoxLoss(priors_cxcy, threshold=0.5, neg_pos_ratio=3, alpha=1.0)
    loss = criterion(predicted_locs, predicted_scores, boxes, labels)
    loss = jax.block_until_ready(loss)

    assert loss.shape == () and jnp.isfinite(loss)
    print("KERNEL_OK")
</pallas_src>

<mosaic_0001>
module attributes {stable_mosaic.version = 11 : i64} {
  func.func @_match_kernel(%arg0: i32, %arg1: memref<1x8x4xf32, #tpu.memory_space<vmem>>, %arg2: memref<4x256xf32, #tpu.memory_space<vmem>>, %arg3: memref<1x1x256xf32, #tpu.memory_space<vmem>>, %arg4: memref<1x1x256xi32, #tpu.memory_space<vmem>>, %arg5: memref<1x8x1xi32, #tpu.memory_space<vmem>>) attributes {dimension_semantics = [#tpu.dimension_semantics<parallel>], iteration_bounds = array<i64: 2>, scalar_prefetch = 0 : i64, scratch_operands = 0 : i64, tpu.core_type = #tpu.core_type<tc>, window_params = [{transform_indices = @transform_0, window_bounds = array<i64: 1, 8, 4>}, {pipeline_mode = #tpu.pipeline_mode<synchronous>, transform_indices = @transform_1, window_bounds = array<i64: 4, 256>}, {transform_indices = @transform_2, window_bounds = array<i64: 1, 1, 256>}, {transform_indices = @transform_3, window_bounds = array<i64: 1, 1, 256>}, {transform_indices = @transform_4, window_bounds = array<i64: 1, 8, 1>}]} {
    %c0 = arith.constant 0 : index
    %c0_0 = arith.constant 0 : index
    %c0_1 = arith.constant 0 : index
    %0 = vector.load %arg1[%c0, %c0_0, %c0_1] : memref<1x8x4xf32, #tpu.memory_space<vmem>>, vector<1x8x4xf32>
    %1 = vector.shape_cast %0 : vector<1x8x4xf32> to vector<8x4xf32>
    %c0_2 = arith.constant 0 : index
    %c0_3 = arith.constant 0 : index
    %2 = vector.load %arg2[%c0_2, %c0_3] : memref<4x256xf32, #tpu.memory_space<vmem>>, vector<4x256xf32>
    %3 = vector.extract_strided_slice %1 {offsets = [0, 0], sizes = [8, 1], strides = [1, 1]} : vector<8x4xf32> to vector<8x1xf32>
    %4 = vector.extract_strided_slice %1 {offsets = [0, 1], sizes = [8, 1], strides = [1, 1]} : vector<8x4xf32> to vector<8x1xf32>
    %5 = vector.extract_strided_slice %1 {offsets = [0, 2], sizes = [8, 1], strides = [1, 1]} : vector<8x4xf32> to vector<8x1xf32>
    %6 = vector.extract_strided_slice %1 {offsets = [0, 3], sizes = [8, 1], strides = [1, 1]} : vector<8x4xf32> to vector<8x1xf32>
    %7 = vector.extract_strided_slice %2 {offsets = [0, 0], sizes = [1, 256], strides = [1, 1]} : vector<4x256xf32> to vector<1x256xf32>
    %8 = vector.extract_strided_slice %2 {offsets = [1, 0], sizes = [1, 256], strides = [1, 1]} : vector<4x256xf32> to vector<1x256xf32>
    %9 = vector.extract_strided_slice %2 {offsets = [2, 0], sizes = [1, 256], strides = [1, 1]} : vector<4x256xf32> to vector<1x256xf32>
    %10 = vector.extract_strided_slice %2 {offsets = [3, 0], sizes = [1, 256], strides = [1, 1]} : vector<4x256xf32> to vector<1x256xf32>
    %11 = vector.broadcast %5 : vector<8x1xf32> to vector<8x256xf32>
    %12 = vector.broadcast %9 : vector<1x256xf32> to vector<8x256xf32>
    %13 = arith.minimumf %11, %12 : vector<8x256xf32>
    %14 = vector.broadcast %3 : vector<8x1xf32> to vector<8x256xf32>
    %15 = vector.broadcast %7 : vector<1x256xf32> to vector<8x256xf32>
    %16 = arith.maximumf %14, %15 : vector<8x256xf32>
    %17 = arith.subf %13, %16 : vector<8x256xf32>
    %cst = arith.constant 0.000000e+00 : f32
    %18 = vector.broadcast %cst : f32 to vector<8x256xf32>
    %19 = arith.maximumf %17, %18 : vector<8x256xf32>
    %20 = vector.broadcast %6 : vector<8x1xf32> to vector<8x256xf32>
    %21 = vector.broadcast %10 : vector<1x256xf32> to vector<8x256xf32>
    %22 = arith.minimumf %20, %21 : vector<8x256xf32>
    %23 = vector.broadcast %4 : vector<8x1xf32> to vector<8x256xf32>
    %24 = vector.broadcast %8 : vector<1x256xf32> to vector<8x256xf32>
    %25 = arith.maximumf %23, %24 : vector<8x256xf32>
    %26 = arith.subf %22, %25 : vector<8x256xf32>
    %cst_4 = arith.constant 0.000000e+00 : f32
    %27 = vector.broadcast %cst_4 : f32 to vector<8x256xf32>
    %28 = arith.maximumf %26, %27 : vector<8x256xf32>
    %29 = arith.mulf %19, %28 : vector<8x256xf32>
    %30 = arith.subf %5, %3 : vector<8x1xf32>
    %31 = arith.subf %6, %4 : vector<8x1xf32>
    %32 = arith.mulf %30, %31 : vector<8x1xf32>
    %33 = arith.subf %9, %7 : vector<1x256xf32>
    %34 = arith.subf %10, %8 : vector<1x256xf32>
    %35 = arith.mulf %33, %34 : vector<1x256xf32>
    %36 = vector.broadcast %32 : vector<8x1xf32> to vector<8x256xf32>
    %37 = vector.broadcast %35 : vector<1x256xf32> to vector<8x256xf32>
    %38 = arith.addf %36, %37 : vector<8x256xf32>
    %39 = arith.subf %38, %29 : vector<8x256xf32>
    %cst_5 = arith.constant 1.000000e-10 : f32
    %40 = vector.broadcast %cst_5 : f32 to vector<8x256xf32>
    %41 = arith.maximumf %39, %40 : vector<8x256xf32>
    %42 = arith.divf %29, %41 : vector<8x256xf32>
    %cst_6 = arith.constant dense<0xFF800000> : vector<256xf32>
    %43 = vector.multi_reduction <maximumf>, %42, %cst_6 [0] : vector<8x256xf32> to vector<256xf32>
    %44 = vector.shape_cast %43 : vector<256xf32> to vector<1x256xf32>
    %45 = tpu.iota {dimensions = array<i32: 0>} : vector<8x1xi32>
    %46 = vector.broadcast %44 : vector<1x256xf32> to vector<8x256xf32>
    %47 = arith.cmpf oeq, %42, %46 : vector<8x256xf32>
    %c8_i32 = arith.constant 8 : i32
    %48 = vector.shape_cast %45 : vector<8x1xi32> to vector<8x1xi32>
    %49 = vector.broadcast %48 : vector<8x1xi32> to vector<8x256xi32>
    %50 = vector.broadcast %c8_i32 : i32 to vector<8x256xi32>
    %51 = arith.select %47, %49, %50 : vector<8x256xi1>, vector<8x256xi32>
    %cst_7 = arith.constant dense<2147483647> : vector<256xi32>
    %52 = vector.multi_reduction <minsi>, %51, %cst_7 [0] : vector<8x256xi32> to vector<256xi32>
    %53 = vector.shape_cast %52 : vector<256xi32> to vector<1x256xi32>
    %c0_8 = arith.constant 0 : index
    %c0_9 = arith.constant 0 : index
    %c0_10 = arith.constant 0 : index
    %54 = vector.load %arg3[%c0_8, %c0_9, %c0_10] : memref<1x1x256xf32, #tpu.memory_space<vmem>>, vector<1x1x256xf32>
    %55 = vector.shape_cast %54 : vector<1x1x256xf32> to vector<1x256xf32>
    %56 = vector.shape_cast %44 : vector<1x256xf32> to vector<1x1x256xf32>
    tpu.vector_store %arg3[%c0_8, %c0_9, %c0_10], %56 {strides = array<i32>} : memref<1x1x256xf32, #tpu.memory_space<vmem>>, vector<1x1x256xf32>,
    %c0_11 = arith.constant 0 : index
    %c0_12 = arith.constant 0 : index
    %c0_13 = arith.constant 0 : index
    %57 = vector.load %arg4[%c0_11, %c0_12, %c0_13] : memref<1x1x256xi32, #tpu.memory_space<vmem>>, vector<1x1x256xi32>
    %58 = vector.shape_cast %57 : vector<1x1x256xi32> to vector<1x256xi32>
    %59 = vector.shape_cast %53 : vector<1x256xi32> to vector<1x1x256xi32>
    tpu.vector_store %arg4[%c0_11, %c0_12, %c0_13], %59 {strides = array<i32>} : memref<1x1x256xi32, #tpu.memory_space<vmem>>, vector<1x1x256xi32>,
    %cst_14 = arith.constant dense<0xFF800000> : vector<8xf32>
    %60 = vector.multi_reduction <maximumf>, %42, %cst_14 [1] : vector<8x256xf32> to vector<8xf32>
    %61 = vector.shape_cast %60 : vector<8xf32> to vector<8x1xf32>
    %62 = tpu.iota {dimensions = array<i32: 1>} : vector<1x256xi32>
    %63 = vector.broadcast %61 : vector<8x1xf32> to vector<8x256xf32>
    %64 = arith.cmpf oeq, %42, %63 : vector<8x256xf32>
    %c256_i32 = arith.constant 256 : i32
    %65 = vector.shape_cast %62 : vector<1x256xi32> to vector<1x256xi32>
    %66 = vector.broadcast %65 : vector<1x256xi32> to vector<8x256xi32>
    %67 = vector.broadcast %c256_i32 : i32 to vector<8x256xi32>
    %68 = arith.select %64, %66, %67 : vector<8x256xi1>, vector<8x256xi32>
    %cst_15 = arith.constant dense<2147483647> : vector<8xi32>
    %69 = vector.multi_reduction <minsi>, %68, %cst_15 [1] : vector<8x256xi32> to vector<8xi32>
    %70 = vector.shape_cast %69 : vector<8xi32> to vector<8x1xi32>
    %c0_16 = arith.constant 0 : index
    %c0_17 = arith.constant 0 : index
    %c0_18 = arith.constant 0 : index
    %71 = vector.load %arg5[%c0_16, %c0_17, %c0_18] : memref<1x8x1xi32, #tpu.memory_space<vmem>>, vector<1x8x1xi32>
    %72 = vector.shape_cast %71 : vector<1x8x1xi32> to vector<8x1xi32>
    %73 = vector.shape_cast %70 : vector<8x1xi32> to vector<1x8x1xi32>
    tpu.vector_store %arg5[%c0_16, %c0_17, %c0_18], %73 {strides = array<i32>} : memref<1x8x1xi32, #tpu.memory_space<vmem>>, vector<1x8x1xi32>,
    return
  }
  func.func @transform_0(%arg0: i32) -> (i32, i32, i32) {
    %c0_i32 = arith.constant 0 : i32
    %c0_i32_0 = arith.constant 0 : i32
    %c0_i32_1 = arith.constant 0 : i32
    return %arg0, %c0_i32, %c0_i32_0 : i32, i32, i32
  }
  func.func @transform_1(%arg0: i32) -> (i32, i32) {
    %c0_i32 = arith.constant 0 : i32
    %c0_i32_0 = arith.constant 0 : i32
    %c0_i32_1 = arith.constant 0 : i32
    return %c0_i32, %c0_i32_0 : i32, i32
  }
  func.func @transform_2(%arg0: i32) -> (i32, i32, i32) {
    %c0_i32 = arith.constant 0 : i32
    %c0_i32_0 = arith.constant 0 : i32
    %c0_i32_1 = arith.constant 0 : i32
    return %arg0, %c0_i32, %c0_i32_0 : i32, i32, i32
  }
  func.func @transform_3(%arg0: i32) -> (i32, i32, i32) {
    %c0_i32 = arith.constant 0 : i32
    %c0_i32_0 = arith.constant 0 : i32
    %c0_i32_1 = arith.constant 0 : i32
    return %arg0, %c0_i32, %c0_i32_0 : i32, i32, i32
  }
  func.func @transform_4(%arg0: i32) -> (i32, i32, i32) {
    %c0_i32 = arith.constant 0 : i32
    %c0_i32_0 = arith.constant 0 : i32
    %c0_i32_1 = arith.constant 0 : i32
    return %arg0, %c0_i32, %c0_i32_0 : i32, i32, i32
  }
}

</mosaic_0001>

<bundles_post_ra>
// kernel: tpu_custom_call.1
= control target key start
LH: loop header
LB: loop body
LE: loop exit
PB: predicated region body
PF: predicated region fallthrough
CT: control target
= control target key end

     0   :  { %10 = vsyncpa [#allocation3], 0  ;;  %s1022_s0 = inlined_call_operand.vmem [shape: f32[2,8,4], index: 0, kind: input, shape index: {}]   ;;  %s1023_s1 = inlined_call_operand.vmem [shape: f32[4,256], index: 1, kind: input, shape index: {}]   ;;  %s1024_s2 = inlined_call_operand.hbm [shape: f32[2,1,256], index: 2, kind: output, shape index: {0}]   ;;  %s1025_s3 = inlined_call_operand.hbm [shape: s32[2,1,256], index: 3, kind: output, shape index: {1}]   ;;  %s1026_s4 = inlined_call_operand.vmem [shape: s32[2,8,1], index: 4, kind: output, shape index: {2}]  }
   0x1   :  { %12 = vsyncpa [#allocation3 + $0x1], 0 }
   0x2   :  { %13 = vsyncpa [#allocation5], 0 }
   0x3   :  { %15 = vsyncpa [#allocation5 + $0x1], 0  ;;  %s844_s15 = smov 0   ;;  %s846_s16 = smov 0  }
   0x4   :  { %s848_s17 = smov 0   ;;  %s850_s18 = smov 0  }
   0x5 LB: > { %s865_s19 = sadd.s32 4294967295, %s808_s18   ;;  %s634_s20 = sadd.s32 4294967294, %s808_s18   ;;  %s808_s18 = sphi %s850_s18, %s1034_s18   ;;  %s804_s17 = sphi %s848_s17, %s1033_s17   ;;  %s800_s16 = sphi %s846_s16, %s1032_s16   ;;  %s796_s15 = sphi %s844_s15, %s1031_s15  }
   0x6   : > { %s869_s21 = sadd.s32 1, %s808_s18   ;;  %s75_s22 = sadd.s32 1, %s804_s17 }
   0x7   : > { %s72_s23 = ssub.s32 %s808_s18, %s869_s21  ;;  %p85_p0 = scmp.ne.s32.totalorder %s804_s17, %s800_s16 }
   0x8   : > { %p73_p1 = scmp.eq.s32.totalorder %s72_s23, 0  ;;  %p86_p2 = scmp.eq.s32.totalorder %s865_s19, 1 }
   0x9   : > { %p91_p3 = scmp.ne.s32.totalorder %s800_s16, %s796_s15  ;;  %p92_p4 = scmp.eq.s32.totalorder %s634_s20, 1 }
   0xa   : > { %s880_s24 = scalar_select %p73_p1, %s804_s17, %s75_s22  }
   0xb   : > { %p882_p5 = por %p86_p2, %p85_p0  ;;  %p886_p6 = por %p92_p4, %p91_p3 }
   0xc   : > { %p637_p7 = scmp.ge.s32.totalorder %s808_s18, 1  ;;  %p172_p8 = scmp.lt.s32.totalorder %s808_s18, 3 }
   0xe   : > { %p173_p9 = pnand %p637_p7, %p172_p8 }
   0xf   : > { %p206_p10 = scmp.lt.s32.totalorder (!%p173_p9), %s865_s19, 1  ;;  %v810_v0 = vmov (!%p173_p9), 2   ;;  %v811_v1 = vmov (!%p173_p9), 3   ;;  %s812_s6 = smov (!%p173_p9), 2   ;;  %v813_v3 = vmov (!%p173_p9), 0   ;;  %v814_v4 = vmov (!%p173_p9), 1  }
  0x10   : > { %176 = sbr.rel (%p173_p9) target bundleno = 853 (0x355), region = 28  ;;  %704 = vset.pattern.permute.xlu1 (!%p173_p9), %v810_v0  ;;  %706 = vset.pattern.permute.xlu0 (!%p173_p9), %v811_v1  ;;  %s815_s7 = smov (!%p173_p9), 127   ;;  %v222_v9 = vlaneseq (!%p173_p9)  ;;  %v215_v12 = vld [vmem:[%s1023_s1] sm:$0xff] (!%p173_p9) }
  0x11   : > { %v333_v17 = vrot.slane (!%p173_p9), %v215_v12, 6  ;;  %s917_s10 = sand.u32 (!%p173_p9), 1, %s800_s16   ;;  %s651_s14 = sshll.u32 (!%p173_p9), %s865_s19, 5 }
  0x12   : > { %v903_v10 = vshrl.u32 (!%p173_p9), %v222_v9, 7  ;;  %s638_s11 = sshll.u32 (!%p173_p9), %s917_s10, 1  ;;  %vm924_vm3 = vcmp.lt.s32.totalorder (!%p173_p9), %v222_v9, 256  ;;  %s953_s29 = scalar_lea.hbm (!%p173_p9), %s1024_s2, %s651_s14 }
  0x13   : > { %v335_v27 = vsub.f32 (!%p173_p9), %v215_v12, %v333_v17  ;;  %s930_s12 = scalar_lea.vmem (!%p173_p9), [#allocation2], %s638_s11  ;;  %s937_s13 = scalar_lea.vmem (!%p173_p9), [#allocation4], %s638_s11 }
  0x14   : > { %v224_v13 = vsub.s32 (!%p173_p9), 2, %v903_v10  ;;  %v228_v14 = vsub.s32 (!%p173_p9), 6, %v903_v10  ;;  %v248_v15 = vsub.s32 (!%p173_p9), 0, %v903_v10  ;;  %v252_v16 = vsub.s32 (!%p173_p9), 4, %v903_v10  ;;  %s502_s20 = sshll.u32 (!%p173_p9), %s930_s12, 4  ;;  %s479_s30 = scalar_lea.sflag (!%p173_p9), [#allocation3], %s917_s10  ;;  %s503_s20 = int_to_ptr.vmem [resolvable:$true] %s502_s20 }
  0x15   : > { %v300_v18 = vsub.s32 (!%p173_p9), 1, %v903_v10  ;;  %v304_v19 = vsub.s32 (!%p173_p9), 5, %v903_v10  ;;  %v276_v20 = vsub.s32 (!%p173_p9), 3, %v903_v10  ;;  %v280_v21 = vsub.s32 (!%p173_p9), 7, %v903_v10 }
  0x16   : > { %v225_v22 = vrot.slane (!%p173_p9), %v215_v12, %v224_v13  ;;  %v229_v23 = vrot.slane (!%p173_p9), %v215_v12, %v228_v14  ;;  %v249_v24 = vrot.slane (!%p173_p9), %v215_v12, %v248_v15  ;;  %v253_v25 = vrot.slane (!%p173_p9), %v215_v12, %v252_v16 }
  0x17   : > { %s894_s27 = scalar_select %p206_p10, %s865_s19, 1  ;;  %v301_v28 = vrot.slane %v215_v12, %v300_v18  ;;  %v305_v29 = vrot.slane %v215_v12, %v304_v19  ;;  %v277_v30 = vrot.slane %v215_v12, %v276_v20  ;;  %v281_v31 = vrot.slane %v215_v12, %v280_v21 }
  0x18   : > { %v235_v32 = vrot.slane %v225_v22, %v224_v13  ;;  %v239_v33 = vrot.slane %v229_v23, %v224_v13  ;;  %v259_v34 = vrot.slane %v249_v24, %v248_v15  ;;  %v263_v35 = vrot.slane %v253_v25, %v248_v15 }
  0x19   : > { %s640_s28 = sshll.u32 %s894_s27, 3  ;;  %v642_v36 = vrot.slane %v335_v27, 9  ;;  %v311_v37 = vrot.slane %v301_v28, %v300_v18  ;;  %v315_v38 = vrot.slane %v305_v29, %v300_v18  ;;  %v287_v39 = vrot.slane %v277_v30, %v276_v20 }
  0x1a   : > { %s209_s5 = scalar_lea.vmem %s1022_s0, %s640_s28  ;;  %v291_v40 = vrot.slane %v281_v31, %v276_v20  ;;  %v816_v20 = vmov 1966171168  }
  0x1b   : > { %v214_v2 = vld [vmem:[%s209_s5] sm:$0xff]  ;;  %v340_v47 = vmul.f32 %v642_v36, %v335_v27  ;;  %v415_v21 = vunpack.c.l.s4 %v816_v20  ;;  %s714_s5 = scalar_lea.vmem %s503_s20, 32 }
  0x1c   : > { %324 = vrot.lane.b32.xlu0 %v214_v2, %s812_s6  ;;  %218 = vperm.xlu1 %704, %v214_v2   ;;  %p715_p11 = scmp.ne.s32.totalorder %s503_s20, %s714_s5  ;;  %s817_s6 = smov [#allocation2]  }
  0x1d   : > { %v350_v52 = vrot.slane %v340_v47, %v224_v13  ;;  %v354_v53 = vrot.slane %v340_v47, %v228_v14 }
  0x1e   : > { %p716_p12 = pnand %p715_p11, %p882_p5 }
  0x1f   : > { %v360_v58 = vrot.slane %v350_v52, %v224_v13  ;;  %v364_v59 = vrot.slane %v354_v53, %v224_v13  ;;  %v454_v52 = vand.u32 127, %v222_v9 }
  0x20   : > { %705 = vset.pattern.permute.xlu1 %v813_v3  ;;  %p717_p13 = pneg %p716_p12 }
  0x21   : > { %243 = vperm.xlu1 %705, %v214_v2   ;;  %v455_v53 = vadd.s32 128, %v454_v52 }
  0x25   : > { %707 = vset.pattern.permute.xlu1 %v814_v4 }
  0x26   : > { %295 = vperm.xlu1 %707, %v214_v2  }
  0x2a   : > { %708 = vset.pattern.permute.xlu1 %v810_v0 }
  0x8e   : > { %v325_v5 = vpop.permute.xlu0 %324 }
  0x8f   : > { %v327_v6 = vsub.f32 %v214_v2, %v325_v5 }
  0x91   : > { %329 = vrot.lane.b32.xlu0 %v327_v6, %s815_s7  ;;  %s718_s7 = sshll.u32 %s817_s6, 4  ;;  %s719_s7 = int_to_ptr.vmem [resolvable:$false] %s718_s7 }
  0x92   : > { %s720_s8 = scalar_lea.vmem %s719_s7, 64  ;;  %p721_p0 = scmp.lt.s32.totalorder %s503_s20, %s719_s7 }
  0x93   : > { %p722_p1 = scmp.lt.s32.totalorder %s720_s8, %s714_s5 }
  0x95   : > { %271 = vperm.xlu0 %706, %v214_v2   ;;  %p723_p2 = por %p722_p1, %p721_p0 }
  0x97   : > { %p724_p3 = pnand %p723_p2, %p717_p13 }
  0x99   : > { %709 = vset.pattern.permute.xlu0 %v810_v0 }
  0x9b   : > { %v219_v11 = vpop.permute.xlu1 %218 }
  0x9c   : > { %v240_v43 = vmin.f32 %v219_v11, %v235_v32  ;;  %v241_v44 = vmin.f32 %v219_v11, %v239_v33 }
  0xa0   : > { %v244_v26 = vpop.permute.xlu1 %243 }
  0xa1   : > { %v264_v45 = vmax.f32 %v244_v26, %v259_v34  ;;  %v265_v46 = vmax.f32 %v244_v26, %v263_v35  ;;  %v416_v26 = vunpack.c.0.s8 %v415_v21 }
  0xa3   : > { %v266_v54 = vsub.f32 %v240_v43, %v264_v45  ;;  %v267_v55 = vsub.f32 %v241_v44, %v265_v46  ;;  %v419_v31 = vsub.s32 %v416_v26, %v903_v10 }
  0xa5   : > { %v296_v41 = vpop.permute.xlu1 %295  ;;  %v268_v60 = vmax.f32 %v266_v54, 0.0  ;;  %v269_v61 = vmax.f32 %v267_v55, 0.0 }
  0xa6   : > { %v316_v48 = vmax.f32 %v296_v41, %v311_v37  ;;  %v317_v49 = vmax.f32 %v296_v41, %v315_v38 }
 0x103   : > { %v330_v7 = vpop.permute.xlu0 %329 }
 0x104   : > { %v332_v8 = vmul.f32 %v330_v7, %v327_v6 }
 0x106   : > { %343 = vperm.xlu1 %708, %v332_v8  }
 0x114   : > { %v272_v42 = vpop.permute.xlu0 %271 }
 0x115   : > { %v292_v50 = vmin.f32 %v272_v42, %v287_v39  ;;  %v293_v51 = vmin.f32 %v272_v42, %v291_v40 }
 0x117   : > { %v318_v56 = vsub.f32 %v292_v50, %v316_v48  ;;  %v319_v57 = vsub.f32 %v293_v51, %v317_v49 }
 0x119   : > { %v320_v62 = vmax.f32 %v318_v56, 0.0  ;;  %v321_v63 = vmax.f32 %v319_v57, 0.0 }
 0x11b   : > { %v322_v1 = vmul.f32 %v320_v62, %v268_v60  ;;  %v323_v2 = vmul.f32 %v321_v63, %v269_v61 }
 0x185   : > { %v344_v0 = vpop.permute.xlu1 %343 }
 0x186   : > { %v365_v3 = vadd.f32 %v360_v58, %v344_v0  ;;  %v366_v4 = vadd.f32 %v364_v59, %v344_v0 }
 0x188   : > { %v367_v5 = vsub.f32 %v365_v3, %v322_v1  ;;  %v368_v6 = vsub.f32 %v366_v4, %v323_v2 }
 0x18a   : > { %v369_v7 = vmax.f32 %v367_v5, 1e-10  ;;  %v370_v8 = vmax.f32 %v368_v6, 1e-10 }
 0x18c   : > { %710 = vrcp.f32 %v369_v7 }
 0x18d   : > { %712 = vrcp.f32 %v370_v8 }
 0x196   : > { %v711_v11 = vpop.eup %710 }
 0x197   : > { %v713_v12 = vpop.eup %712  ;;  %v372_v14 = vmul.f32 %v711_v11, %v322_v1 }
 0x198   : > { %v374_v15 = vmul.f32 %v713_v12, %v323_v2 }
 0x199   : > { %v375_v13 = vrot.slane %v372_v14, 4 }
 0x19a   : > { %v450_v16 = vmax.f32 %v372_v14, %v374_v15  ;;  %v381_v17 = vrot.slane %v374_v15, 4 }
 0x19b   : > { %v376_v18 = vmax.f32 %v372_v14, %v375_v13 }
 0x19c   : > { %451 = vmax.xlane.f32.xlu0 %v450_v16  ;;  %v382_v19 = vmax.f32 %v374_v15, %v381_v17 }
 0x19d   : > { %v377_v22 = vrot.slane %v376_v18, 2 }
 0x19e   : > { %v383_v23 = vrot.slane %v382_v19, 2 }
 0x19f   : > { %v378_v24 = vmax.f32 %v376_v18, %v377_v22 }
 0x1a0   : > { %v384_v25 = vmax.f32 %v382_v19, %v383_v23 }
 0x1a1   : > { %v379_v27 = vrot.slane %v378_v24, 1 }
 0x1a2   : > { %v385_v28 = vrot.slane %v384_v25, 1 }
 0x1a3   : > { %v380_v29 = vmax.f32 %v378_v24, %v379_v27 }
 0x1a4   : > { %v386_v30 = vmax.f32 %v384_v25, %v385_v28 }
 0x1a5   : > { %vm389_vm0 = vcmp.eq.f32.partialorder %v372_v14, %v380_v29 }
 0x1a6   : > { %vm390_vm1 = vcmp.eq.f32.partialorder %v374_v15, %v386_v30  ;;  %v391_v32 = vsel %vm389_vm0, %v903_v10, 8  ;;  %v413_v33 = vcombine.low %v380_v29, %v386_v30 }
 0x1a7   : > { %v392_v34 = vsel %vm390_vm1, %v903_v10, 8  ;;  %v393_v35 = vrot.slane %v391_v32, 4 }
 0x1a8   : > { %v402_v36 = vrot.slane %v392_v34, 4  ;;  %v420_v37 = vrot.slane %v413_v33, %v419_v31 }
 0x1a9   : > { %vm394_vm2 = vcmp.lt.s32.totalorder %v391_v32, %v393_v35 }
 0x1aa   : > { %vm403_vm4 = vcmp.lt.s32.totalorder %v392_v34, %v402_v36  ;;  %v427_v39 = vrot.slane %v420_v37, %v419_v31  ;;  %v395_v40 = vsel %vm394_vm2, %v391_v32, %v393_v35 }
 0x1ab   : > { %v396_v41 = vrot.slane %v395_v40, 2  ;;  %v404_v42 = vsel %vm403_vm4, %v392_v34, %v402_v36 }
 0x1ac   : > { %433 = vst.msk [vmem:[%s930_s12] sm:$0x3] %vm924_vm3, %v427_v39  ;;  %v405_v10 = vrot.slane %v404_v42, 2 }
 0x1ad   : > { %vm397_vm5 = vcmp.lt.s32.totalorder %v395_v40, %v396_v41 }
 0x1ae   : > { %v398_v43 = vsel %vm397_vm5, %v395_v40, %v396_v41  ;;  %vm406_vm6 = vcmp.lt.s32.totalorder %v404_v42, %v405_v10 }
 0x1af   : > { %v399_v44 = vrot.slane %v398_v43, 1  ;;  %v407_v45 = vsel %vm406_vm6, %v404_v42, %v405_v10 }
 0x1b0   : > { %v408_v46 = vrot.slane %v407_v45, 1 }
 0x1b1   : > { %vm400_vm7 = vcmp.lt.s32.totalorder %v398_v43, %v399_v44 }
 0x1b2   : > { %v401_v47 = vsel %vm400_vm7, %v398_v43, %v399_v44  ;;  %vm409_vm8 = vcmp.lt.s32.totalorder %v407_v45, %v408_v46 }
 0x1b3   : > { %v410_v48 = vsel %vm409_vm8, %v407_v45, %v408_v46 }
 0x1b4   : > { %v434_v49 = vcombine.low %v401_v47, %v410_v48 }
 0x1b6   : > { %v441_v50 = vrot.slane %v434_v49, %v419_v31 }
 0x1b8   : > { %v448_v51 = vrot.slane %v441_v50, %v419_v31 }
 0x1ba   : > { %449 = vst.msk [vmem:[%s937_s13] sm:$0x3] %vm924_vm3, %v448_v51 }
 0x229   : > { %v452_v54 = vpop.xlane.xlu0 %451 }
 0x22a   : > { %vm456_vm9 = vcmp.eq.f32.partialorder %v372_v14, %v452_v54  ;;  %vm457_vm10 = vcmp.eq.f32.partialorder %v374_v15, %v452_v54 }
 0x22b   : > { %v458_v55 = vsel %vm456_vm9, %v454_v52, 256  ;;  %v459_v56 = vsel %vm457_vm10, %v455_v53, 256 }
 0x22c   : > { %vm460_vm11 = vcmp.lt.s32.totalorder %v458_v55, %v459_v56 }
 0x22d   : > { %v461_v57 = vsel %vm460_vm11, %v458_v55, %v459_v56 }
 0x22e   : > { %v463_v58 = vshra.s32 %v461_v57, 16  ;;  %v462_v60 = vand.u32 65535, %v461_v57 }
 0x230   : > { %v465_v59 = vcvt.s32.f32 %v463_v58  ;;  %v464_v9 = vcvt.s32.f32 %v462_v60 }
 0x232   : > { %466 = vmin.xlane.f32.xlu1 %v465_v59 }
 0x2bf   : > { %v943_v61 = vpop.xlane.xlu1 %466 }
 0x2c0   : > { %vm468_vm12 = vcmp.eq.f32.partialorder %v465_v59, %v943_v61 }
 0x2c1   : > { %v469_v62 = vsel %vm468_vm12, %v464_v9, inf }
 0x2c2   : > { %470 = vmin.xlane.f32.xlu0 %v469_v62 }
 0x2c3   : > { %727 = shalt.err (!%p724_p3)
}
 0x2c4   : > { %s728_s9 = scalar_lea.hbm %s953_s29, 32  ;;  %s732_s22 = scalar_lea.hbm %s1024_s2, 64 }
 0x2c5   : > { %p729_p4 = scmp.ne.s32.totalorder %s953_s29, %s728_s9  ;;  %p733_p9 = scmp.lt.u32.totalorder %s953_s29, %s1024_s2 }
 0x2c6   : > { %p734_p10 = scmp.lt.u32.totalorder %s732_s22, %s728_s9  ;;  %p736_p12 = scmp.lt.u32.totalorder %s728_s9, %s953_s29 }
 0x2c7   : > { %p730_p7 = pnand %p729_p4, %p882_p5 }
 0x2c8   : > { %p735_p11 = por %p734_p10, %p733_p9 }
 0x2c9   : > { %p731_p8 = pneg %p730_p7 }
 0x2ca   : > { %p737_p13 = por %p736_p12, %p735_p11 }
 0x2cc   : > { %p738_p0 = pnand %p737_p13, %p731_p8 }
 0x2ce   : > { %741 = shalt.err (!%p738_p0)
}
 0x2cf   : > { %653 = dma.vmem_to_hbm [thread:$0]  (%p882_p5), %s503_s20, 32, %s953_s29, %s479_s30  }
 0x2d0   : > { %s978_s8 = scalar_lea.hbm %s1025_s3, %s651_s14  ;;  %s516_s11 = sshll.u32 %s937_s13, 4  ;;  %s517_s11 = int_to_ptr.vmem [resolvable:$true] %s516_s11 }
 0x2d1   : > { %s484_s9 = scalar_lea.sflag [#allocation5], %s917_s10  ;;  %s742_s12 = scalar_lea.vmem %s517_s11, 32 }
 0x2d2   : > { %p743_p1 = scmp.ne.s32.totalorder %s517_s11, %s742_s12  ;;  %s818_s22 = smov [#allocation4]  }
 0x2d3   : > { %s746_s23 = sshll.u32 %s818_s22, 4  ;;  %s747_s23 = int_to_ptr.vmem [resolvable:$false] %s746_s23 }
 0x2d4   : > { %p744_p2 = pnand %p743_p1, %p882_p5  ;;  %s748_s6 = scalar_lea.vmem %s747_s23, 64 }
 0x2d5   : > { %p749_p4 = scmp.lt.s32.totalorder %s517_s11, %s747_s23  ;;  %p750_p7 = scmp.lt.s32.totalorder %s748_s6, %s742_s12 }
 0x2d6   : > { %p745_p3 = pneg %p744_p2 }
 0x2d7   : > { %p751_p8 = por %p750_p7, %p749_p4 }
 0x2d9   : > { %p752_p9 = pnand %p751_p8, %p745_p3 }
 0x2db   : > { %755 = shalt.err (!%p752_p9)
}
 0x2dc   : > { %s756_s19 = scalar_lea.hbm %s978_s8, 32  ;;  %s760_s14 = scalar_lea.hbm %s1025_s3, 64 }
 0x2dd   : > { %p757_p10 = scmp.ne.s32.totalorder %s978_s8, %s756_s19  ;;  %p761_p13 = scmp.lt.u32.totalorder %s978_s8, %s1025_s3 }
 0x2de   : > { %p762_p0 = scmp.lt.u32.totalorder %s760_s14, %s756_s19  ;;  %p764_p2 = scmp.lt.u32.totalorder %s756_s19, %s978_s8 }
 0x2df   : > { %p758_p11 = pnand %p757_p10, %p882_p5 }
 0x2e0   : > { %p763_p1 = por %p762_p0, %p761_p13 }
 0x2e1   : > { %p759_p12 = pneg %p758_p11 }
 0x2e2   : > { %p765_p3 = por %p764_p2, %p763_p1 }
 0x2e4   : > { %p766_p4 = pnand %p765_p3, %p759_p12 }
 0x2e6   : > { %769 = shalt.err (!%p766_p4)
}
 0x2e7   : > { %654 = dma.vmem_to_hbm [thread:$0]  (%p882_p5), %s517_s11, 32, %s978_s8, %s484_s9   ;;  %v473_v63 = vcvt.f32.s32 %v943_v61  ;;  %vm476_vm13 = vcmask 7168  }
 0x2e8   : > { %s213_s7 = scalar_lea.vmem %s1026_s4, %s640_s28 }
 0x2e9   : > { %v474_v1 = vshll.u32 %v473_v63, 16 }
 0x34f   : > { %v471_v0 = vpop.xlane.xlu0 %470 }
 0x350   : > { %v472_v2 = vcvt.f32.s32 %v471_v0 }
 0x352   : > { %v475_v3 = vadd.s32 %v474_v1, %v472_v2 }
 0x354   : > { %477 = vst.msk [vmem:[%s213_s7] sm:$0xff] %vm476_vm13, %v475_v3 }
 0x355 PF: > { %p664_p7 = scmp.ge.s32.totalorder %s808_s18, 2  ;;  %s531_s25 = sand.u32 1, %s796_s15  }
 0x356   : > { %s532_s8 = scalar_lea.sflag [#allocation3], %s531_s25 }
 0x357   : > { %p658_p5 = pnand %p664_p7, %p886_p6 }
 0x359   : > { %787 = dma.done.wait (!%p658_p5), %s532_s8, 32  }
 0x35a   : > { %789 = vsyncadd (!%p658_p5), %s532_s8, 4294967264  ;;  %s541_s11 = scalar_lea.sflag [#allocation5], %s531_s25 }
 0x35b   : > { %791 = dma.done.wait (!%p658_p5), %s541_s11, 32  }
 0x35c   : > { %793 = vsyncadd (!%p658_p5), %s541_s11, 4294967264  ;;  %p18_p8 = scmp.ge.s32.totalorder %s869_s21, 4   ;;  %s1031_s15 = smov %s800_s16 }
 0x35d   : > { %s1032_s16 = smov %s804_s17  ;;  %s1033_s17 = smov %s880_s24 }
 0x35e   : > { %s1034_s18 = smov %s869_s21  ;;  %20 = sbr.rel (!%p18_p8) target bundleno = 5 (0x5), region = 92 }
 0x365   :  { %553 = vsyncpa [#allocation3], 1 }
 0x366   :  { %555 = vsyncpa [#allocation3 + $0x1], 1 }
 0x367   :  { %556 = vsyncpa [#allocation5], 1 }
 0x368   :  { %558 = vsyncpa [#allocation5 + $0x1], 1 }

</bundles_post_ra>
